<compile_context>
chip_gen: v5e
topology: v5e:2x2
jax: 0.10.0
libtpu: 0.0.40
codegen_flags: <defaults>
</compile_context>

<pallas_src>
import jax
import jax.numpy as jnp
from jax.experimental import pallas as pl
from jax.experimental.pallas import tpu as pltpu


def _round_up(x, m):
    return ((x + m - 1) // m) * m


def _pad_to(x, target_shape):
    pads = [(0, t - s) for s, t in zip(x.shape, target_shape)]
    if any(p[1] for p in pads):
        return jnp.pad(x, pads)
    return x


def _vmem_capacity_bytes():
    try:
        return int(pltpu.get_tpu_info().vmem_capacity_bytes)
    except Exception:
        return 128 << 20  # v5e / v6e physical VMEM


# ----------------------------- kernels --------------------------------------


def _mlp_kernel_resident(x_ref, w1_ref, b1_ref, w2_ref, b2_ref, w3_ref, b3_ref,
                         o_ref):
    """Whole MLP fused in one body; all weights resident in VMEM.

    Matmul inputs are fed in the weight dtype (bf16 params -> native bf16 MXU
    path); accumulation, bias add and ReLU stay in f32.
    """
    x = x_ref[...].astype(w1_ref.dtype)

    h1 = jnp.dot(x, w1_ref[...], preferred_element_type=jnp.float32)
    h1 = jnp.maximum(h1 + b1_ref[...].astype(jnp.float32), 0.0)

    h2 = jnp.dot(h1.astype(w2_ref.dtype), w2_ref[...],
                 preferred_element_type=jnp.float32)
    h2 = jnp.maximum(h2 + b2_ref[...].astype(jnp.float32), 0.0)

    out = jnp.dot(h2.astype(w3_ref.dtype), w3_ref[...],
                  preferred_element_type=jnp.float32)
    o_ref[...] = (out + b3_ref[...].astype(jnp.float32)).astype(o_ref.dtype)


def _mlp_kernel_ktiled(x_ref, w1_ref, b1_ref, w2_ref, b2_ref, w3_ref, b3_ref,
                       o_ref, acc_ref):
    """Large-hidden fallback: fc2's contraction (hidden) is tiled over the last
    ("arbitrary") grid axis. Per step k:
        h1_k  = relu(x @ w1[:, kT:(k+1)T] + b1[kT:(k+1)T])       (exact slice)
        acc  += h1_k @ w2[kT:(k+1)T, :]
    and at the final step fc2 bias + ReLU + fc3 are applied. w1/w2 stream
    through VMEM instead of being fully resident.
    """
    k = pl.program_id(1)

    @pl.when(k == 0)
    def _():
        acc_ref[...] = jnp.zeros_like(acc_ref)

    x = x_ref[...].astype(w1_ref.dtype)
    h1 = jnp.dot(x, w1_ref[...], preferred_element_type=jnp.float32)
    h1 = jnp.maximum(h1 + b1_ref[...].astype(jnp.float32), 0.0)
    acc_ref[...] += jnp.dot(h1.astype(w2_ref.dtype), w2_ref[...],
                            preferred_element_type=jnp.float32)

    @pl.when(k == pl.num_programs(1) - 1)
    def _():
        h2 = jnp.maximum(acc_ref[...] + b2_ref[...].astype(jnp.float32), 0.0)
        out = jnp.dot(h2.astype(w3_ref.dtype), w3_ref[...],
                      preferred_element_type=jnp.float32)
        o_ref[...] = (out + b3_ref[...].astype(jnp.float32)).astype(o_ref.dtype)


# ----------------------------- wrapper ---------------------------------------


def prepare_params(params, *, compute_dtype=None):
    """One-time padding (and optional bf16 cast) of the Linear parameters.

    params: dict w1,b1,w2,b2,w3,b3 with weights stored as (in_features,
    out_features), i.e. transposed vs. PyTorch nn.Linear. Zero-padding to
    128-multiples keeps the math exact through bias-add and ReLU.
    """
    state_dim, hidden_dim = params["w1"].shape
    goal_dim = params["w3"].shape[1]
    Kp = _round_up(state_dim, 128)
    Hp = _round_up(hidden_dim, 128)
    Gp = _round_up(goal_dim, 128)

    def prep(a, shape):
        a = jnp.asarray(a)
        if compute_dtype is not None:
            a = a.astype(compute_dtype)
        return _pad_to(a, shape)

    return dict(
        w1=prep(params["w1"], (Kp, Hp)),
        b1=prep(jnp.reshape(params["b1"], (1, -1)), (1, Hp)),
        w2=prep(params["w2"], (Hp, Hp)),
        b2=prep(jnp.reshape(params["b2"], (1, -1)), (1, Hp)),
        w3=prep(params["w3"], (Hp, Gp)),
        b3=prep(jnp.reshape(params["b3"], (1, -1)), (1, Gp)),
        dims=(state_dim, hidden_dim, goal_dim, Kp, Hp, Gp),
    )


def high_level_policy_forward(state, prepared, *, block_b=None,
                              force_ktiled=False, ktile_h=None):
    """state: (B, state_dim). prepared: output of prepare_params()."""
    state_dim, hidden_dim, goal_dim, Kp, Hp, Gp = prepared["dims"]
    B = state.shape[0]
    assert state.shape[1] == state_dim

    a_bytes = jnp.dtype(state.dtype).itemsize
    o_bytes = a_bytes
    w_bytes = jnp.dtype(prepared["w1"].dtype).itemsize

    # ---- generation-aware VMEM budget ---------------------------------------
    vmem_cap = _vmem_capacity_bytes()
    # Proxy: the 64 MiB-per-TensorCore generation (v7x) is also the 2-TC one.
    is_small_vmem = vmem_cap <= (64 << 20)
    headroom = (8 << 20) if is_small_vmem else (16 << 20)
    budget = vmem_cap - headroom

    weight_total_bytes = (Kp * Hp + Hp * Hp + Hp * Gp + 2 * Hp + Gp) * w_bytes

    # ---- path selection: resident weights vs. fc2-K-tiled accumulator -------
    use_ktiled = force_ktiled or (weight_total_bytes > int(0.6 * budget))

    if use_ktiled:
        if ktile_h is None:
            ktile_h = next(t for t in (512, 256, 128) if Hp % t == 0)
        tH = int(ktile_h)
        assert tH % 128 == 0 and Hp % tH == 0, "ktile_h must be a 128-multiple dividing Hp"
        nk = Hp // tH
        # streamed (double-buffered) w1/b1/w2 slices + resident b2/w3/b3
        fixed_bytes = (2 * (Kp * tH + tH + tH * Hp)
                       + (Hp + Hp * Gp + Gp)) * w_bytes
        per_row_bytes = (2 * Kp * a_bytes + 2 * Gp * o_bytes
                         + Hp * 4                 # f32 accumulator scratch
                         + 2 * max(Hp, Gp) * 4)   # transient f32 intermediates
    else:
        tH, nk = Hp, 1
        fixed_bytes = weight_total_bytes          # single-buffered residents
        per_row_bytes = (2 * Kp * a_bytes + 2 * Gp * o_bytes
                         + 3 * max(Hp, Gp) * 4)

    # ---- batch tiling --------------------------------------------------------
    B_pad = _round_up(B, 8)
    if block_b is None:
        gen_cap = 1024
        avail = max(budget - fixed_bytes - (4 << 20), 8 * per_row_bytes)
        cap_from_vmem = max(8, (avail // per_row_bytes) // 8 * 8)
        block_cap = int(min(gen_cap, cap_from_vmem))
    else:
        block_cap = _round_up(max(int(block_b), 8), 8)

    n_steps = pl.cdiv(B_pad, block_cap)
    # v7x only: give each of the 2 TensorCores its own batch tile when the batch
    # is large enough to keep the MXU filled. v5e/v6e are single-core; the grid
    # is a serial loop there, so never force a split.
    if is_small_vmem and n_steps < 2 and B_pad >= 256:
        n_steps = 2
    blk_b = _round_up(pl.cdiv(B_pad, n_steps), 8)
    B_final = n_steps * blk_b                      # blk_b divides B_final exactly

    # ---- VMEM limit & cost estimate ------------------------------------------
    vmem_needed = fixed_bytes + blk_b * per_row_bytes
    vmem_limit = int(min(budget, max(vmem_needed * 1.4 + (8 << 20), 32 << 20)))

    flops = 2 * B_final * (Kp * Hp + Hp * Hp + Hp * Gp)
    bytes_accessed = B_final * (Kp * a_bytes + Gp * o_bytes) + weight_total_bytes
    cost = pl.CostEstimate(flops=flops, transcendentals=0,
                           bytes_accessed=bytes_accessed)

    # Per-call activation pad only (no-op when already aligned).
    x_p = _pad_to(state, (B_final, Kp))

    def run(single_buffer_resident):
        pm = dict(pipeline_mode=pl.Buffered(1)) if single_buffer_resident else {}

        def const_spec(shape, imap):
            return pl.BlockSpec(shape, imap, **pm)

        if not use_ktiled:
            grid = (n_steps,)
            in_specs = [
                pl.BlockSpec((blk_b, Kp), lambda i: (i, 0)),   # state tile
                const_spec((Kp, Hp), lambda i: (0, 0)),        # w1 (resident)
                const_spec((1, Hp), lambda i: (0, 0)),         # b1
                const_spec((Hp, Hp), lambda i: (0, 0)),        # w2
                const_spec((1, Hp), lambda i: (0, 0)),         # b2
                const_spec((Hp, Gp), lambda i: (0, 0)),        # w3
                const_spec((1, Gp), lambda i: (0, 0)),         # b3
            ]
            out_specs = pl.BlockSpec((blk_b, Gp), lambda i: (i, 0))
            scratch_shapes = []
            kernel = _mlp_kernel_resident
            dim_sem = ("parallel",)
        else:
            grid = (n_steps, nk)
            in_specs = [
                pl.BlockSpec((blk_b, Kp), lambda i, k: (i, 0)),  # state (resident over k)
                pl.BlockSpec((Kp, tH), lambda i, k: (0, k)),     # w1 column slice
                pl.BlockSpec((1, tH), lambda i, k: (0, k)),      # b1 slice
                pl.BlockSpec((tH, Hp), lambda i, k: (k, 0)),     # w2 row slice
                const_spec((1, Hp), lambda i, k: (0, 0)),        # b2 (resident)
                const_spec((Hp, Gp), lambda i, k: (0, 0)),       # w3 (resident)
                const_spec((1, Gp), lambda i, k: (0, 0)),        # b3 (resident)
            ]
            out_specs = pl.BlockSpec((blk_b, Gp), lambda i, k: (i, 0))
            scratch_shapes = [pltpu.VMEM((blk_b, Hp), jnp.float32)]
            kernel = _mlp_kernel_ktiled
            dim_sem = ("parallel", "arbitrary")

        return pl.pallas_call(
            kernel,
            out_shape=jax.ShapeDtypeStruct((B_final, Gp), state.dtype),
            grid_spec=pltpu.PrefetchScalarGridSpec(
                num_scalar_prefetch=0,
                grid=grid,
                in_specs=in_specs,
                out_specs=out_specs,
                scratch_shapes=scratch_shapes,
            ),
            compiler_params=pltpu.CompilerParams(
                dimension_semantics=dim_sem,
                vmem_limit_bytes=vmem_limit,
            ),
            cost_estimate=cost,
        )(x_p, prepared["w1"], prepared["b1"], prepared["w2"], prepared["b2"],
          prepared["w3"], prepared["b3"])

    try:
        out_padded = run(single_buffer_resident=True)
    except Exception:
        # pipeline_mode=pl.Buffered(1) unsupported on this jax build; fall back
        # to the previously-validated double-buffered resident operands.
        out_padded = run(single_buffer_resident=False)

    # Strip batch / lane padding back to the module's logical output shape.
    return out_padded[:B, :goal_dim]


# ----------------------------- reference / demo ------------------------------


def init_params(key, state_dim, goal_dim, hidden_dim, dtype=jnp.float32):
    """Deterministic synthetic init (PyTorch nn.Linear-like uniform fan-in bounds).
    Weights stored as (in_features, out_features)."""
    ks = jax.random.split(key, 6)

    def linear(kw, kb, fan_in, fan_out):
        bound = 1.0 / jnp.sqrt(jnp.float32(fan_in))
        w = jax.random.uniform(kw, (fan_in, fan_out), dtype, -bound, bound)
        b = jax.random.uniform(kb, (1, fan_out), dtype, -bound, bound)
        return w, b

    w1, b1 = linear(ks[0], ks[1], state_dim, hidden_dim)
    w2, b2 = linear(ks[2], ks[3], hidden_dim, hidden_dim)
    w3, b3 = linear(ks[4], ks[5], hidden_dim, goal_dim)
    return dict(w1=w1, b1=b1, w2=w2, b2=b2, w3=w3, b3=b3)


def reference_forward(state, p):
    h1 = jnp.maximum(state @ p["w1"] + p["b1"], 0.0)
    h2 = jnp.maximum(h1 @ p["w2"] + p["b2"], 0.0)
    return h2 @ p["w3"] + p["b3"]


if __name__ == "__main__":
    key = jax.random.PRNGKey(0)
    k_params, k_params2, k_state = jax.random.split(key, 3)

    # Case 1: resident-weight fast path (small dims, f32).
    batch, state_dim, goal_dim, hidden_dim = 8, 16, 8, 32
    params = init_params(k_params, state_dim, goal_dim, hidden_dim)
    prepared = prepare_params(params)          # one-time pad outside hot path
    state = jax.random.normal(k_state, (batch, state_dim), jnp.float32)

    out = jax.block_until_ready(high_level_policy_forward(state, prepared))
    ref = reference_forward(state, params)
    assert out.shape == (batch, goal_dim)
    assert jnp.allclose(out, ref, atol=1e-5, rtol=1e-5), "resident path mismatch"

    # Case 2: force the fc2-K-tiled accumulator fallback (used automatically when
    # the padded weights would not fit the VMEM budget, e.g. large hidden on v7x).
    hidden_dim2 = 256
    params2 = init_params(k_params2, state_dim, goal_dim, hidden_dim2)
    prepared2 = prepare_params(params2)
    out2 = jax.block_until_ready(
        high_level_policy_forward(state, prepared2, force_ktiled=True, ktile_h=128))
    ref2 = reference_forward(state, params2)
    assert out2.shape == (batch, goal_dim)
    assert jnp.allclose(out2, ref2, atol=1e-4, rtol=1e-4), "k-tiled path mismatch"

    print("KERNEL_OK")
</pallas_src>

<mosaic_0001>
module attributes {stable_mosaic.version = 11 : i64} {
  func.func @_mlp_kernel_resident(%arg0: i32, %arg1: memref<8x128xf32, #tpu.memory_space<vmem>>, %arg2: memref<128x128xf32, #tpu.memory_space<vmem>>, %arg3: memref<1x128xf32, #tpu.memory_space<vmem>>, %arg4: memref<128x128xf32, #tpu.memory_space<vmem>>, %arg5: memref<1x128xf32, #tpu.memory_space<vmem>>, %arg6: memref<128x128xf32, #tpu.memory_space<vmem>>, %arg7: memref<1x128xf32, #tpu.memory_space<vmem>>, %arg8: memref<8x128xf32, #tpu.memory_space<vmem>>) attributes {dimension_semantics = [#tpu.dimension_semantics<parallel>], iteration_bounds = array<i64: 1>, scalar_prefetch = 0 : i64, scratch_operands = 0 : i64, tpu.core_type = #tpu.core_type<tc>, window_params = [{transform_indices = @transform_0, window_bounds = array<i64: 8, 128>}, {pipeline_mode = #tpu.pipeline_mode<synchronous>, transform_indices = @transform_1, window_bounds = array<i64: 128, 128>}, {pipeline_mode = #tpu.pipeline_mode<synchronous>, transform_indices = @transform_2, window_bounds = array<i64: 1, 128>}, {pipeline_mode = #tpu.pipeline_mode<synchronous>, transform_indices = @transform_3, window_bounds = array<i64: 128, 128>}, {pipeline_mode = #tpu.pipeline_mode<synchronous>, transform_indices = @transform_4, window_bounds = array<i64: 1, 128>}, {pipeline_mode = #tpu.pipeline_mode<synchronous>, transform_indices = @transform_5, window_bounds = array<i64: 128, 128>}, {pipeline_mode = #tpu.pipeline_mode<synchronous>, transform_indices = @transform_6, window_bounds = array<i64: 1, 128>}, {transform_indices = @transform_7, window_bounds = array<i64: 8, 128>}]} {
    %c0 = arith.constant 0 : index
    %c0_0 = arith.constant 0 : index
    %0 = vector.load %arg1[%c0, %c0_0] : memref<8x128xf32, #tpu.memory_space<vmem>>, vector<8x128xf32>
    %c0_1 = arith.constant 0 : index
    %c0_2 = arith.constant 0 : index
    %1 = vector.load %arg2[%c0_1, %c0_2] : memref<128x128xf32, #tpu.memory_space<vmem>>, vector<128x128xf32>
    %cst = arith.constant dense<0.000000e+00> : vector<8x128xf32>
    %2 = tpu.matmul %0, %1, %cst {dimension_numbers = #tpu.dot_dimension_numbers<[1], [0], [0], [1], [0, 0, 1, 1], [], []>} : vector<8x128xf32>, vector<128x128xf32>, vector<8x128xf32> -> vector<8x128xf32>
    %c0_3 = arith.constant 0 : index
    %c0_4 = arith.constant 0 : index
    %3 = vector.load %arg3[%c0_3, %c0_4] : memref<1x128xf32, #tpu.memory_space<vmem>>, vector<1x128xf32>
    %4 = vector.broadcast %3 : vector<1x128xf32> to vector<8x128xf32>
    %5 = arith.addf %2, %4 : vector<8x128xf32>
    %cst_5 = arith.constant 0.000000e+00 : f32
    %6 = vector.broadcast %cst_5 : f32 to vector<8x128xf32>
    %7 = arith.maximumf %5, %6 : vector<8x128xf32>
    %c0_6 = arith.constant 0 : index
    %c0_7 = arith.constant 0 : index
    %8 = vector.load %arg4[%c0_6, %c0_7] : memref<128x128xf32, #tpu.memory_space<vmem>>, vector<128x128xf32>
    %cst_8 = arith.constant dense<0.000000e+00> : vector<8x128xf32>
    %9 = tpu.matmul %7, %8, %cst_8 {dimension_numbers = #tpu.dot_dimension_numbers<[1], [0], [0], [1], [0, 0, 1, 1], [], []>} : vector<8x128xf32>, vector<128x128xf32>, vector<8x128xf32> -> vector<8x128xf32>
    %c0_9 = arith.constant 0 : index
    %c0_10 = arith.constant 0 : index
    %10 = vector.load %arg5[%c0_9, %c0_10] : memref<1x128xf32, #tpu.memory_space<vmem>>, vector<1x128xf32>
    %11 = vector.broadcast %10 : vector<1x128xf32> to vector<8x128xf32>
    %12 = arith.addf %9, %11 : vector<8x128xf32>
    %cst_11 = arith.constant 0.000000e+00 : f32
    %13 = vector.broadcast %cst_11 : f32 to vector<8x128xf32>
    %14 = arith.maximumf %12, %13 : vector<8x128xf32>
    %c0_12 = arith.constant 0 : index
    %c0_13 = arith.constant 0 : index
    %15 = vector.load %arg6[%c0_12, %c0_13] : memref<128x128xf32, #tpu.memory_space<vmem>>, vector<128x128xf32>
    %cst_14 = arith.constant dense<0.000000e+00> : vector<8x128xf32>
    %16 = tpu.matmul %14, %15, %cst_14 {dimension_numbers = #tpu.dot_dimension_numbers<[1], [0], [0], [1], [0, 0, 1, 1], [], []>} : vector<8x128xf32>, vector<128x128xf32>, vector<8x128xf32> -> vector<8x128xf32>
    %c0_15 = arith.constant 0 : index
    %c0_16 = arith.constant 0 : index
    %17 = vector.load %arg7[%c0_15, %c0_16] : memref<1x128xf32, #tpu.memory_space<vmem>>, vector<1x128xf32>
    %18 = vector.broadcast %17 : vector<1x128xf32> to vector<8x128xf32>
    %19 = arith.addf %16, %18 : vector<8x128xf32>
    %c0_17 = arith.constant 0 : index
    %c0_18 = arith.constant 0 : index
    %20 = vector.load %arg8[%c0_17, %c0_18] : memref<8x128xf32, #tpu.memory_space<vmem>>, vector<8x128xf32>
    tpu.vector_store %arg8[%c0_17, %c0_18], %19 {strides = array<i32>} : memref<8x128xf32, #tpu.memory_space<vmem>>, vector<8x128xf32>,
    return
  }
  func.func @transform_0(%arg0: i32) -> (i32, i32) {
    %c0_i32 = arith.constant 0 : i32
    %c0_i32_0 = arith.constant 0 : i32
    return %arg0, %c0_i32 : i32, i32
  }
  func.func @transform_1(%arg0: i32) -> (i32, i32) {
    %c0_i32 = arith.constant 0 : i32
    %c0_i32_0 = arith.constant 0 : i32
    %c0_i32_1 = arith.constant 0 : i32
    return %c0_i32, %c0_i32_0 : i32, i32
  }
  func.func @transform_2(%arg0: i32) -> (i32, i32) {
    %c0_i32 = arith.constant 0 : i32
    %c0_i32_0 = arith.constant 0 : i32
    %c0_i32_1 = arith.constant 0 : i32
    return %c0_i32, %c0_i32_0 : i32, i32
  }
  func.func @transform_3(%arg0: i32) -> (i32, i32) {
    %c0_i32 = arith.constant 0 : i32
    %c0_i32_0 = arith.constant 0 : i32
    %c0_i32_1 = arith.constant 0 : i32
    return %c0_i32, %c0_i32_0 : i32, i32
  }
  func.func @transform_4(%arg0: i32) -> (i32, i32) {
    %c0_i32 = arith.constant 0 : i32
    %c0_i32_0 = arith.constant 0 : i32
    %c0_i32_1 = arith.constant 0 : i32
    return %c0_i32, %c0_i32_0 : i32, i32
  }
  func.func @transform_5(%arg0: i32) -> (i32, i32) {
    %c0_i32 = arith.constant 0 : i32
    %c0_i32_0 = arith.constant 0 : i32
    %c0_i32_1 = arith.constant 0 : i32
    return %c0_i32, %c0_i32_0 : i32, i32
  }
  func.func @transform_6(%arg0: i32) -> (i32, i32) {
    %c0_i32 = arith.constant 0 : i32
    %c0_i32_0 = arith.constant 0 : i32
    %c0_i32_1 = arith.constant 0 : i32
    return %c0_i32, %c0_i32_0 : i32, i32
  }
  func.func @transform_7(%arg0: i32) -> (i32, i32) {
    %c0_i32 = arith.constant 0 : i32
    %c0_i32_0 = arith.constant 0 : i32
    return %arg0, %c0_i32 : i32, i32
  }
}

module attributes {stable_mosaic.version = 11 : i64} {
  func.func @_mlp_kernel_resident(%arg0: i32, %arg1: memref<8x128xf32, #tpu.memory_space<vmem>>, %arg2: memref<128x128xf32, #tpu.memory_space<vmem>>, %arg3: memref<1x128xf32, #tpu.memory_space<vmem>>, %arg4: memref<128x128xf32, #tpu.memory_space<vmem>>, %arg5: memref<1x128xf32, #tpu.memory_space<vmem>>, %arg6: memref<128x128xf32, #tpu.memory_space<vmem>>, %arg7: memref<1x128xf32, #tpu.memory_space<vmem>>, %arg8: memref<8x128xf32, #tpu.memory_space<vmem>>) attributes {dimension_semantics = [#tpu.dimension_semantics<parallel>], iteration_bounds = array<i64: 1>, scalar_prefetch = 0 : i64, scratch_operands = 0 : i64, tpu.core_type = #tpu.core_type<tc>, window_params = [{transform_indices = @transform_0, window_bounds = array<i64: 8, 128>}, {pipeline_mode = #tpu.pipeline_mode<synchronous>, transform_indices = @transform_1, window_bounds = array<i64: 128, 128>}, {pipeline_mode = #tpu.pipeline_mode<synchronous>, transform_indices = @transform_2, window_bounds = array<i64: 1, 128>}, {pipeline_mode = #tpu.pipeline_mode<synchronous>, transform_indices = @transform_3, window_bounds = array<i64: 128, 128>}, {pipeline_mode = #tpu.pipeline_mode<synchronous>, transform_indices = @transform_4, window_bounds = array<i64: 1, 128>}, {pipeline_mode = #tpu.pipeline_mode<synchronous>, transform_indices = @transform_5, window_bounds = array<i64: 128, 128>}, {pipeline_mode = #tpu.pipeline_mode<synchronous>, transform_indices = @transform_6, window_bounds = array<i64: 1, 128>}, {transform_indices = @transform_7, window_bounds = array<i64: 8, 128>}]} {
    %c0 = arith.constant 0 : index
    %c0_0 = arith.constant 0 : index
    %0 = vector.load %arg1[%c0, %c0_0] : memref<8x128xf32, #tpu.memory_space<vmem>>, vector<8x128xf32>
    %c0_1 = arith.constant 0 : index
    %c0_2 = arith.constant 0 : index
    %1 = vector.load %arg2[%c0_1, %c0_2] : memref<128x128xf32, #tpu.memory_space<vmem>>, vector<128x128xf32>
    %cst = arith.constant dense<0.000000e+00> : vector<8x128xf32>
    %2 = tpu.matmul %0, %1, %cst {dimension_numbers = #tpu.dot_dimension_numbers<[1], [0], [0], [1], [0, 0, 1, 1], [], []>} : vector<8x128xf32>, vector<128x128xf32>, vector<8x128xf32> -> vector<8x128xf32>
    %c0_3 = arith.constant 0 : index
    %c0_4 = arith.constant 0 : index
    %3 = vector.load %arg3[%c0_3, %c0_4] : memref<1x128xf32, #tpu.memory_space<vmem>>, vector<1x128xf32>
    %4 = vector.broadcast %3 : vector<1x128xf32> to vector<8x128xf32>
    %5 = arith.addf %2, %4 : vector<8x128xf32>
    %cst_5 = arith.constant 0.000000e+00 : f32
    %6 = vector.broadcast %cst_5 : f32 to vector<8x128xf32>
    %7 = arith.maximumf %5, %6 : vector<8x128xf32>
    %c0_6 = arith.constant 0 : index
    %c0_7 = arith.constant 0 : index
    %8 = vector.load %arg4[%c0_6, %c0_7] : memref<128x128xf32, #tpu.memory_space<vmem>>, vector<128x128xf32>
    %cst_8 = arith.constant dense<0.000000e+00> : vector<8x128xf32>
    %9 = tpu.matmul %7, %8, %cst_8 {dimension_numbers = #tpu.dot_dimension_numbers<[1], [0], [0], [1], [0, 0, 1, 1], [], []>} : vector<8x128xf32>, vector<128x128xf32>, vector<8x128xf32> -> vector<8x128xf32>
    %c0_9 = arith.constant 0 : index
    %c0_10 = arith.constant 0 : index
    %10 = vector.load %arg5[%c0_9, %c0_10] : memref<1x128xf32, #tpu.memory_space<vmem>>, vector<1x128xf32>
    %11 = vector.broadcast %10 : vector<1x128xf32> to vector<8x128xf32>
    %12 = arith.addf %9, %11 : vector<8x128xf32>
    %cst_11 = arith.constant 0.000000e+00 : f32
    %13 = vector.broadcast %cst_11 : f32 to vector<8x128xf32>
    %14 = arith.maximumf %12, %13 : vector<8x128xf32>
    %c0_12 = arith.constant 0 : index
    %c0_13 = arith.constant 0 : index
    %15 = vector.load %arg6[%c0_12, %c0_13] : memref<128x128xf32, #tpu.memory_space<vmem>>, vector<128x128xf32>
    %cst_14 = arith.constant dense<0.000000e+00> : vector<8x128xf32>
    %16 = tpu.matmul %14, %15, %cst_14 {dimension_numbers = #tpu.dot_dimension_numbers<[1], [0], [0], [1], [0, 0, 1, 1], [], []>} : vector<8x128xf32>, vector<128x128xf32>, vector<8x128xf32> -> vector<8x128xf32>
    %c0_15 = arith.constant 0 : index
    %c0_16 = arith.constant 0 : index
    %17 = vector.load %arg7[%c0_15, %c0_16] : memref<1x128xf32, #tpu.memory_space<vmem>>, vector<1x128xf32>
    %18 = vector.broadcast %17 : vector<1x128xf32> to vector<8x128xf32>
    %19 = arith.addf %16, %18 : vector<8x128xf32>
    %c0_17 = arith.constant 0 : index
    %c0_18 = arith.constant 0 : index
    %20 = vector.load %arg8[%c0_17, %c0_18] : memref<8x128xf32, #tpu.memory_space<vmem>>, vector<8x128xf32>
    tpu.vector_store %arg8[%c0_17, %c0_18], %19 {strides = array<i32>} : memref<8x128xf32, #tpu.memory_space<vmem>>, vector<8x128xf32>,
    return
  }
  func.func @transform_0(%arg0: i32) -> (i32, i32) {
    %c0_i32 = arith.constant 0 : i32
    %c0_i32_0 = arith.constant 0 : i32
    return %arg0, %c0_i32 : i32, i32
  }
  func.func @transform_1(%arg0: i32) -> (i32, i32) {
    %c0_i32 = arith.constant 0 : i32
    %c0_i32_0 = arith.constant 0 : i32
    %c0_i32_1 = arith.constant 0 : i32
    return %c0_i32, %c0_i32_0 : i32, i32
  }
  func.func @transform_2(%arg0: i32) -> (i32, i32) {
    %c0_i32 = arith.constant 0 : i32
    %c0_i32_0 = arith.constant 0 : i32
    %c0_i32_1 = arith.constant 0 : i32
    return %c0_i32, %c0_i32_0 : i32, i32
  }
  func.func @transform_3(%arg0: i32) -> (i32, i32) {
    %c0_i32 = arith.constant 0 : i32
    %c0_i32_0 = arith.constant 0 : i32
    %c0_i32_1 = arith.constant 0 : i32
    return %c0_i32, %c0_i32_0 : i32, i32
  }
  func.func @transform_4(%arg0: i32) -> (i32, i32) {
    %c0_i32 = arith.constant 0 : i32
    %c0_i32_0 = arith.constant 0 : i32
    %c0_i32_1 = arith.constant 0 : i32
    return %c0_i32, %c0_i32_0 : i32, i32
  }
  func.func @transform_5(%arg0: i32) -> (i32, i32) {
    %c0_i32 = arith.constant 0 : i32
    %c0_i32_0 = arith.constant 0 : i32
    %c0_i32_1 = arith.constant 0 : i32
    return %c0_i32, %c0_i32_0 : i32, i32
  }
  func.func @transform_6(%arg0: i32) -> (i32, i32) {
    %c0_i32 = arith.constant 0 : i32
    %c0_i32_0 = arith.constant 0 : i32
    %c0_i32_1 = arith.constant 0 : i32
    return %c0_i32, %c0_i32_0 : i32, i32
  }
  func.func @transform_7(%arg0: i32) -> (i32, i32) {
    %c0_i32 = arith.constant 0 : i32
    %c0_i32_0 = arith.constant 0 : i32
    return %arg0, %c0_i32 : i32, i32
  }
}

</mosaic_0001>

<bundles_post_ra>
// kernel: tpu_custom_call.1
= control target key start
LH: loop header
LB: loop body
LE: loop exit
PB: predicated region body
PF: predicated region fallthrough
CT: control target
= control target key end

     0   :  { %12 = vsyncpa [#allocation3], 0  ;;  %s440_s0 = inlined_call_operand.hbm [shape: f32[8,128], index: 0, kind: input, shape index: {}]   ;;  %s441_s1 = inlined_call_operand.hbm [shape: f32[128,128], index: 1, kind: input, shape index: {}]   ;;  %s442_s2 = inlined_call_operand.vmem [shape: f32[1,128], index: 2, kind: input, shape index: {}]   ;;  %s443_s3 = inlined_call_operand.hbm [shape: f32[128,128], index: 3, kind: input, shape index: {}]   ;;  %s444_s4 = inlined_call_operand.vmem [shape: f32[1,128], index: 4, kind: input, shape index: {}]   ;;  %s445_s5 = inlined_call_operand.hbm [shape: f32[128,128], index: 5, kind: input, shape index: {}]   ;;  %s446_s6 = inlined_call_operand.vmem [shape: f32[1,128], index: 6, kind: input, shape index: {}]   ;;  %s447_s7 = inlined_call_operand.hbm [shape: f32[8,128], index: 7, kind: output, shape index: {}]  }
   0x1   :  { %13 = vsyncpa [#allocation6], 0 }
   0x2   :  { %14 = vsyncpa [#allocation9], 0  ;;  %s31_s26 = sshll.u32 %s441_s1, 4  ;;  %s32_s26 = int_to_ptr.hbm [resolvable:$true] %s31_s26 }
   0x3   :  { %15 = vsyncpa [#allocation4], 0  ;;  %s369_s27 = smov [#allocation5]   ;;  %s21_s8 = sshll.u32 %s440_s0, 4  ;;  %s22_s8 = int_to_ptr.hbm [resolvable:$true] %s21_s8 }
   0x4   :  { %s33_s28 = sshll.u32 %s369_s27, 4  ;;  %s370_s9 = smov 128   ;;  %s34_s28 = int_to_ptr.vmem [resolvable:$true] %s33_s28 }
   0x5   :  { %s371_s10 = smov 8   ;;  %s372_s11 = smov [#allocation2]  }
   0x6   :  { %39 = dma.hbm_to_vmem [thread:$0]  %s32_s26, 2048, %s34_s28, [#allocation6], %s370_s9, %s370_s9, %s371_s10  }
   0x7   :  { %s23_s12 = sshll.u32 %s372_s11, 4  ;;  %s46_s15 = sshll.u32 %s443_s3, 4  ;;  %s24_s12 = int_to_ptr.vmem [resolvable:$true] %s23_s12  ;;  %s47_s15 = int_to_ptr.hbm [resolvable:$true] %s46_s15 }
   0x8   :  { %26 = dma.hbm_to_vmem [thread:$0]  %s22_s8, 128, %s24_s12, [#allocation3]  }
   0x9   :  { %s61_s17 = sshll.u32 %s445_s5, 4  ;;  %s373_s18 = smov [#allocation7]   ;;  %s62_s17 = int_to_ptr.hbm [resolvable:$true] %s61_s17 }
   0xa   :  { %s48_s19 = sshll.u32 %s373_s18, 4  ;;  %s374_s0 = smov [#allocation8]   ;;  %s49_s19 = int_to_ptr.vmem [resolvable:$true] %s48_s19 }
   0xb   :  { %54 = dma.hbm_to_vmem [thread:$0]  %s47_s15, 2048, %s49_s19, [#allocation6], %s370_s9, %s370_s9, %s371_s10  }
   0xc   :  { %s63_s20 = sshll.u32 %s374_s0, 4  ;;  %s64_s20 = int_to_ptr.vmem [resolvable:$true] %s63_s20 }
   0xd   :  { %69 = dma.hbm_to_vmem [thread:$0]  %s62_s17, 2048, %s64_s20, [#allocation9], %s370_s9, %s370_s9, %s371_s10  }
   0xe   :  { %361 = dma.done.wait [#allocation3], 128  }
   0xf   :  { %362 = vsyncadd [#allocation3], 4294967168 }
  0x10   :  { %363 = dma.done.wait [#allocation6], 4096  }
  0x11   :  { %364 = vsyncadd [#allocation6], 4294963200 }
  0x12   :  { %365 = dma.done.wait [#allocation9], 2048  }
  0x13   :  { %366 = vsyncadd [#allocation9], 4294965248  ;;  %v104_v0 = vld [vmem:[#allocation5 + $0x78] sm:$0xff]  ;;  %v103_v1 = vld [vmem:[#allocation5 + $0x70] sm:$0xff]  ;;  %s375_s24 = smov [#allocation10]   ;;  %s219_s28 = sshll.u32 %s447_s7, 4  ;;  %s220_s28 = int_to_ptr.hbm [resolvable:$true] %s219_s28 }
  0x14   :  { %109 = vmatpush.msra.mxu0 %v104_v0  ;;  %v102_v2 = vld [vmem:[#allocation5 + $0x68] sm:$0xff]  ;;  %v101_v3 = vld [vmem:[#allocation5 + $0x60] sm:$0xff]  ;;  %v145_v4 = vld [vmem:[#allocation7 + $0x78] sm:$0xff]  ;;  %s217_s25 = sshll.u32 %s375_s24, 4  ;;  %s218_s25 = int_to_ptr.vmem [resolvable:$true] %s217_s25 }
  0x15   :  { %v100_v5 = vld [vmem:[#allocation5 + $0x58] sm:$0xff]  ;;  %150 = vmatpush.msra.mxu1 %v145_v4  ;;  %v144_v6 = vld [vmem:[#allocation7 + $0x70] sm:$0xff]  ;;  %v143_v7 = vld [vmem:[#allocation7 + $0x68] sm:$0xff] }
  0x16   :  { %110 = vmatpush.msra.mxu0 %v103_v1  ;;  %v99_v8 = vld [vmem:[#allocation5 + $0x50] sm:$0xff]  ;;  %v142_v9 = vld [vmem:[#allocation7 + $0x60] sm:$0xff]  ;;  %v98_v10 = vld [vmem:[#allocation5 + $0x48] sm:$0xff] }
  0x17   :  { %151 = vmatpush.msra.mxu1 %v144_v6  ;;  %v141_v11 = vld [vmem:[#allocation7 + $0x58] sm:$0xff]  ;;  %v97_v12 = vld [vmem:[#allocation5 + $0x40] sm:$0xff]  ;;  %v140_v13 = vld [vmem:[#allocation7 + $0x50] sm:$0xff] }
  0x18   :  { %111 = vmatpush.msra.mxu0 %v102_v2  ;;  %v96_v14 = vld [vmem:[#allocation5 + $0x38] sm:$0xff]  ;;  %v139_v15 = vld [vmem:[#allocation7 + $0x48] sm:$0xff]  ;;  %v95_v16 = vld [vmem:[#allocation5 + $0x30] sm:$0xff] }
  0x19   :  { %152 = vmatpush.msra.mxu1 %v143_v7  ;;  %v138_v17 = vld [vmem:[#allocation7 + $0x40] sm:$0xff]  ;;  %v94_v18 = vld [vmem:[#allocation5 + $0x28] sm:$0xff]  ;;  %v137_v19 = vld [vmem:[#allocation7 + $0x38] sm:$0xff] }
  0x1a   :  { %112 = vmatpush.msra.mxu0 %v101_v3  ;;  %v93_v20 = vld [vmem:[#allocation5 + $0x20] sm:$0xff]  ;;  %v136_v21 = vld [vmem:[#allocation7 + $0x30] sm:$0xff]  ;;  %v92_v22 = vld [vmem:[#allocation5 + $0x18] sm:$0xff] }
  0x1b   :  { %153 = vmatpush.msra.mxu1 %v142_v9  ;;  %v135_v23 = vld [vmem:[#allocation7 + $0x28] sm:$0xff]  ;;  %v91_v24 = vld [vmem:[#allocation5 + $0x10] sm:$0xff]  ;;  %v134_v25 = vld [vmem:[#allocation7 + $0x20] sm:$0xff] }
  0x1c   :  { %113 = vmatpush.msra.mxu0 %v100_v5  ;;  %v90_v26 = vld [vmem:[#allocation5 + $0x8] sm:$0xff]  ;;  %v133_v27 = vld [vmem:[#allocation7 + $0x18] sm:$0xff]  ;;  %v89_v28 = vld [vmem:[#allocation5] sm:$0xff] }
  0x1d   :  { %154 = vmatpush.msra.mxu1 %v141_v11  ;;  %v88_v29 = vld [vmem:[#allocation2] sm:$0xff]  ;;  %v132_v30 = vld [vmem:[#allocation7 + $0x10] sm:$0xff]  ;;  %v131_v31 = vld [vmem:[#allocation7 + $0x8] sm:$0xff] }
  0x1e   :  { %114 = vmatpush.msra.mxu0 %v99_v8  ;;  %v130_v32 = vld [vmem:[#allocation7] sm:$0xff]  ;;  %v186_v33 = vld [vmem:[#allocation8 + $0x78] sm:$0xff]  ;;  %v185_v34 = vld [vmem:[#allocation8 + $0x70] sm:$0xff] }
  0x1f   :  { %155 = vmatpush.msra.mxu1 %v140_v13  ;;  %191 = vmatpush.msra.mxu2 %v186_v33  ;;  %v184_v35 = vld [vmem:[#allocation8 + $0x68] sm:$0xff]  ;;  %v183_v36 = vld [vmem:[#allocation8 + $0x60] sm:$0xff]  ;;  %v182_v37 = vld [vmem:[#allocation8 + $0x58] sm:$0xff] }
  0x20   :  { %115 = vmatpush.msra.mxu0 %v98_v10  ;;  %v181_v38 = vld [vmem:[#allocation8 + $0x50] sm:$0xff]  ;;  %v180_v39 = vld [vmem:[#allocation8 + $0x48] sm:$0xff]  ;;  %v179_v40 = vld [vmem:[#allocation8 + $0x40] sm:$0xff] }
  0x21   :  { %156 = vmatpush.msra.mxu1 %v139_v15  ;;  %192 = vmatpush.msra.mxu2 %v185_v34  ;;  %v178_v41 = vld [vmem:[#allocation8 + $0x38] sm:$0xff]  ;;  %v177_v42 = vld [vmem:[#allocation8 + $0x30] sm:$0xff]  ;;  %v176_v43 = vld [vmem:[#allocation8 + $0x28] sm:$0xff] }
  0x22   :  { %116 = vmatpush.msra.mxu0 %v97_v12  ;;  %v175_v44 = vld [vmem:[#allocation8 + $0x20] sm:$0xff]  ;;  %v174_v45 = vld [vmem:[#allocation8 + $0x18] sm:$0xff]  ;;  %v173_v50 = vld [vmem:[#allocation8 + $0x10] sm:$0xff] }
  0x23   :  { %157 = vmatpush.msra.mxu1 %v138_v17  ;;  %193 = vmatpush.msra.mxu2 %v184_v35  ;;  %v238_v46 = vld [vmem:[%s442_s2] ss:$0 sm:$0xff]  ;;  %v172_v51 = vld [vmem:[#allocation8 + $0x8] sm:$0xff]  ;;  %v171_v52 = vld [vmem:[#allocation8] sm:$0xff] }
  0x24   :  { %117 = vmatpush.msra.mxu0 %v96_v14  ;;  %v239_v53 = vld [vmem:[%s444_s4] ss:$0 sm:$0xff] }
  0x25   :  { %158 = vmatpush.msra.mxu1 %v137_v19  ;;  %194 = vmatpush.msra.mxu2 %v183_v36  ;;  %v240_v57 = vld [vmem:[%s446_s6] ss:$0 sm:$0xff] }
  0x26   :  { %118 = vmatpush.msra.mxu0 %v95_v16 }
  0x27   :  { %159 = vmatpush.msra.mxu1 %v136_v21  ;;  %195 = vmatpush.msra.mxu2 %v182_v37 }
  0x28   :  { %119 = vmatpush.msra.mxu0 %v94_v18 }
  0x29   :  { %160 = vmatpush.msra.mxu1 %v135_v23  ;;  %196 = vmatpush.msra.mxu2 %v181_v38 }
  0x2a   :  { %120 = vmatpush.msra.mxu0 %v93_v20 }
  0x2b   :  { %161 = vmatpush.msra.mxu1 %v134_v25  ;;  %197 = vmatpush.msra.mxu2 %v180_v39 }
  0x2c   :  { %121 = vmatpush.msra.mxu0 %v92_v22 }
  0x2d   :  { %162 = vmatpush.msra.mxu1 %v133_v27  ;;  %198 = vmatpush.msra.mxu2 %v179_v40 }
  0x2e   :  { %122 = vmatpush.msra.mxu0 %v91_v24 }
  0x2f   :  { %163 = vmatpush.msra.mxu1 %v132_v30  ;;  %199 = vmatpush.msra.mxu2 %v178_v41 }
  0x30   :  { %123 = vmatpush.msra.mxu0 %v90_v26 }
  0x31   :  { %164 = vmatpush.msra.mxu1 %v131_v31  ;;  %200 = vmatpush.msra.mxu2 %v177_v42 }
  0x32   :  { %124 = vmatpush.msra.mxu0 %v89_v28 }
  0x33   :  { %125 = vmatmul.f32.vlgmr.msra.gmra.mxu0 %v88_v29  ;;  %165 = vmatpush.msra.mxu1 %v130_v32 }
  0x34   :  { %201 = vmatpush.msra.mxu2 %v176_v43 }
  0x36   :  { %202 = vmatpush.msra.mxu2 %v175_v44 }
  0x38   :  { %203 = vmatpush.msra.mxu2 %v174_v45 }
  0x3a   :  { %204 = vmatpush.msra.mxu2 %v173_v50 }
  0x3c   :  { %205 = vmatpush.msra.mxu2 %v172_v51 }
  0x3e   :  { %206 = vmatpush.msra.mxu2 %v171_v52 }
  0xb0   :  { %v126_v47 = vpop.f32.mrf.mxu0 }
  0xb1   :  { %v127_v48 = vadd.f32 %v238_v46, %v126_v47 }
  0xb3   :  { %v129_v49 = vmax.f32 %v127_v48, 0.0 }
  0xb5   :  { %166 = vmatmul.f32.vlgmr.msra.gmra.mxu1 %v129_v49 }
 0x132   :  { %v167_v54 = vpop.f32.mrf.mxu1 }
 0x133   :  { %v168_v55 = vadd.f32 %v239_v53, %v167_v54 }
 0x135   :  { %v170_v56 = vmax.f32 %v168_v55, 0.0 }
 0x137   :  { %207 = vmatmul.f32.vlgmr.msra.gmra.mxu2 %v170_v56 }
 0x1ba   :  { %v208_v58 = vpop.f32.mrf.mxu2 }
 0x1bb   :  { %v209_v59 = vadd.f32 %v240_v57, %v208_v58 }
 0x1bd   :  { %211 = vst [vmem:[#allocation10] sm:$0xff] %v209_v59 }
 0x1be   :  { %222 = dma.vmem_to_hbm [thread:$0]  %s218_s25, 128, %s220_s28, [#allocation4]  }
 0x1bf   :  { %367 = dma.done.wait [#allocation4], 128  }
 0x1c0   :  { %368 = vsyncadd [#allocation4], 4294967168 }
 0x1c1   :  { %227 = vsyncpa [#allocation3], 1 }
 0x1c2   :  { %228 = vsyncpa [#allocation6], 1 }
 0x1c3   :  { %229 = vsyncpa [#allocation9], 1 }
 0x1c4   :  { %230 = vsyncpa [#allocation4], 1 }

// kernel: tpu_custom_call.1
= control target key start
LH: loop header
LB: loop body
LE: loop exit
PB: predicated region body
PF: predicated region fallthrough
CT: control target
= control target key end

     0   :  { %12 = vsyncpa [#allocation3], 0  ;;  %s440_s0 = inlined_call_operand.hbm [shape: f32[8,128], index: 0, kind: input, shape index: {}]   ;;  %s441_s1 = inlined_call_operand.hbm [shape: f32[128,128], index: 1, kind: input, shape index: {}]   ;;  %s442_s2 = inlined_call_operand.vmem [shape: f32[1,128], index: 2, kind: input, shape index: {}]   ;;  %s443_s3 = inlined_call_operand.hbm [shape: f32[128,128], index: 3, kind: input, shape index: {}]   ;;  %s444_s4 = inlined_call_operand.vmem [shape: f32[1,128], index: 4, kind: input, shape index: {}]   ;;  %s445_s5 = inlined_call_operand.hbm [shape: f32[128,128], index: 5, kind: input, shape index: {}]   ;;  %s446_s6 = inlined_call_operand.vmem [shape: f32[1,128], index: 6, kind: input, shape index: {}]   ;;  %s447_s7 = inlined_call_operand.hbm [shape: f32[8,128], index: 7, kind: output, shape index: {}]  }
   0x1   :  { %13 = vsyncpa [#allocation6], 0 }
   0x2   :  { %14 = vsyncpa [#allocation9], 0  ;;  %s31_s26 = sshll.u32 %s441_s1, 4  ;;  %s32_s26 = int_to_ptr.hbm [resolvable:$true] %s31_s26 }
   0x3   :  { %15 = vsyncpa [#allocation4], 0  ;;  %s369_s27 = smov [#allocation5]   ;;  %s21_s8 = sshll.u32 %s440_s0, 4  ;;  %s22_s8 = int_to_ptr.hbm [resolvable:$true] %s21_s8 }
   0x4   :  { %s33_s28 = sshll.u32 %s369_s27, 4  ;;  %s370_s9 = smov 128   ;;  %s34_s28 = int_to_ptr.vmem [resolvable:$true] %s33_s28 }
   0x5   :  { %s371_s10 = smov 8   ;;  %s372_s11 = smov [#allocation2]  }
   0x6   :  { %39 = dma.hbm_to_vmem [thread:$0]  %s32_s26, 2048, %s34_s28, [#allocation6], %s370_s9, %s370_s9, %s371_s10  }
   0x7   :  { %s23_s12 = sshll.u32 %s372_s11, 4  ;;  %s46_s15 = sshll.u32 %s443_s3, 4  ;;  %s24_s12 = int_to_ptr.vmem [resolvable:$true] %s23_s12  ;;  %s47_s15 = int_to_ptr.hbm [resolvable:$true] %s46_s15 }
   0x8   :  { %26 = dma.hbm_to_vmem [thread:$0]  %s22_s8, 128, %s24_s12, [#allocation3]  }
   0x9   :  { %s61_s17 = sshll.u32 %s445_s5, 4  ;;  %s373_s18 = smov [#allocation7]   ;;  %s62_s17 = int_to_ptr.hbm [resolvable:$true] %s61_s17 }
   0xa   :  { %s48_s19 = sshll.u32 %s373_s18, 4  ;;  %s374_s0 = smov [#allocation8]   ;;  %s49_s19 = int_to_ptr.vmem [resolvable:$true] %s48_s19 }
   0xb   :  { %54 = dma.hbm_to_vmem [thread:$0]  %s47_s15, 2048, %s49_s19, [#allocation6], %s370_s9, %s370_s9, %s371_s10  }
   0xc   :  { %s63_s20 = sshll.u32 %s374_s0, 4  ;;  %s64_s20 = int_to_ptr.vmem [resolvable:$true] %s63_s20 }
   0xd   :  { %69 = dma.hbm_to_vmem [thread:$0]  %s62_s17, 2048, %s64_s20, [#allocation9], %s370_s9, %s370_s9, %s371_s10  }
   0xe   :  { %361 = dma.done.wait [#allocation3], 128  }
   0xf   :  { %362 = vsyncadd [#allocation3], 4294967168 }
  0x10   :  { %363 = dma.done.wait [#allocation6], 4096  }
  0x11   :  { %364 = vsyncadd [#allocation6], 4294963200 }
  0x12   :  { %365 = dma.done.wait [#allocation9], 2048  }
  0x13   :  { %366 = vsyncadd [#allocation9], 4294965248  ;;  %v104_v0 = vld [vmem:[#allocation5 + $0x78] sm:$0xff]  ;;  %v103_v1 = vld [vmem:[#allocation5 + $0x70] sm:$0xff]  ;;  %s375_s24 = smov [#allocation10]   ;;  %s219_s28 = sshll.u32 %s447_s7, 4  ;;  %s220_s28 = int_to_ptr.hbm [resolvable:$true] %s219_s28 }
  0x14   :  { %109 = vmatpush.msra.mxu0 %v104_v0  ;;  %v102_v2 = vld [vmem:[#allocation5 + $0x68] sm:$0xff]  ;;  %v101_v3 = vld [vmem:[#allocation5 + $0x60] sm:$0xff]  ;;  %v145_v4 = vld [vmem:[#allocation7 + $0x78] sm:$0xff]  ;;  %s217_s25 = sshll.u32 %s375_s24, 4  ;;  %s218_s25 = int_to_ptr.vmem [resolvable:$true] %s217_s25 }
  0x15   :  { %v100_v5 = vld [vmem:[#allocation5 + $0x58] sm:$0xff]  ;;  %150 = vmatpush.msra.mxu1 %v145_v4  ;;  %v144_v6 = vld [vmem:[#allocation7 + $0x70] sm:$0xff]  ;;  %v143_v7 = vld [vmem:[#allocation7 + $0x68] sm:$0xff] }
  0x16   :  { %110 = vmatpush.msra.mxu0 %v103_v1  ;;  %v99_v8 = vld [vmem:[#allocation5 + $0x50] sm:$0xff]  ;;  %v142_v9 = vld [vmem:[#allocation7 + $0x60] sm:$0xff]  ;;  %v98_v10 = vld [vmem:[#allocation5 + $0x48] sm:$0xff] }
  0x17   :  { %151 = vmatpush.msra.mxu1 %v144_v6  ;;  %v141_v11 = vld [vmem:[#allocation7 + $0x58] sm:$0xff]  ;;  %v97_v12 = vld [vmem:[#allocation5 + $0x40] sm:$0xff]  ;;  %v140_v13 = vld [vmem:[#allocation7 + $0x50] sm:$0xff] }
  0x18   :  { %111 = vmatpush.msra.mxu0 %v102_v2  ;;  %v96_v14 = vld [vmem:[#allocation5 + $0x38] sm:$0xff]  ;;  %v139_v15 = vld [vmem:[#allocation7 + $0x48] sm:$0xff]  ;;  %v95_v16 = vld [vmem:[#allocation5 + $0x30] sm:$0xff] }
  0x19   :  { %152 = vmatpush.msra.mxu1 %v143_v7  ;;  %v138_v17 = vld [vmem:[#allocation7 + $0x40] sm:$0xff]  ;;  %v94_v18 = vld [vmem:[#allocation5 + $0x28] sm:$0xff]  ;;  %v137_v19 = vld [vmem:[#allocation7 + $0x38] sm:$0xff] }
  0x1a   :  { %112 = vmatpush.msra.mxu0 %v101_v3  ;;  %v93_v20 = vld [vmem:[#allocation5 + $0x20] sm:$0xff]  ;;  %v136_v21 = vld [vmem:[#allocation7 + $0x30] sm:$0xff]  ;;  %v92_v22 = vld [vmem:[#allocation5 + $0x18] sm:$0xff] }
  0x1b   :  { %153 = vmatpush.msra.mxu1 %v142_v9  ;;  %v135_v23 = vld [vmem:[#allocation7 + $0x28] sm:$0xff]  ;;  %v91_v24 = vld [vmem:[#allocation5 + $0x10] sm:$0xff]  ;;  %v134_v25 = vld [vmem:[#allocation7 + $0x20] sm:$0xff] }
  0x1c   :  { %113 = vmatpush.msra.mxu0 %v100_v5  ;;  %v90_v26 = vld [vmem:[#allocation5 + $0x8] sm:$0xff]  ;;  %v133_v27 = vld [vmem:[#allocation7 + $0x18] sm:$0xff]  ;;  %v89_v28 = vld [vmem:[#allocation5] sm:$0xff] }
  0x1d   :  { %154 = vmatpush.msra.mxu1 %v141_v11  ;;  %v88_v29 = vld [vmem:[#allocation2] sm:$0xff]  ;;  %v132_v30 = vld [vmem:[#allocation7 + $0x10] sm:$0xff]  ;;  %v131_v31 = vld [vmem:[#allocation7 + $0x8] sm:$0xff] }
  0x1e   :  { %114 = vmatpush.msra.mxu0 %v99_v8  ;;  %v130_v32 = vld [vmem:[#allocation7] sm:$0xff]  ;;  %v186_v33 = vld [vmem:[#allocation8 + $0x78] sm:$0xff]  ;;  %v185_v34 = vld [vmem:[#allocation8 + $0x70] sm:$0xff] }
  0x1f   :  { %155 = vmatpush.msra.mxu1 %v140_v13  ;;  %191 = vmatpush.msra.mxu2 %v186_v33  ;;  %v184_v35 = vld [vmem:[#allocation8 + $0x68] sm:$0xff]  ;;  %v183_v36 = vld [vmem:[#allocation8 + $0x60] sm:$0xff]  ;;  %v182_v37 = vld [vmem:[#allocation8 + $0x58] sm:$0xff] }
  0x20   :  { %115 = vmatpush.msra.mxu0 %v98_v10  ;;  %v181_v38 = vld [vmem:[#allocation8 + $0x50] sm:$0xff]  ;;  %v180_v39 = vld [vmem:[#allocation8 + $0x48] sm:$0xff]  ;;  %v179_v40 = vld [vmem:[#allocation8 + $0x40] sm:$0xff] }
  0x21   :  { %156 = vmatpush.msra.mxu1 %v139_v15  ;;  %192 = vmatpush.msra.mxu2 %v185_v34  ;;  %v178_v41 = vld [vmem:[#allocation8 + $0x38] sm:$0xff]  ;;  %v177_v42 = vld [vmem:[#allocation8 + $0x30] sm:$0xff]  ;;  %v176_v43 = vld [vmem:[#allocation8 + $0x28] sm:$0xff] }
  0x22   :  { %116 = vmatpush.msra.mxu0 %v97_v12  ;;  %v175_v44 = vld [vmem:[#allocation8 + $0x20] sm:$0xff]  ;;  %v174_v45 = vld [vmem:[#allocation8 + $0x18] sm:$0xff]  ;;  %v173_v50 = vld [vmem:[#allocation8 + $0x10] sm:$0xff] }
  0x23   :  { %157 = vmatpush.msra.mxu1 %v138_v17  ;;  %193 = vmatpush.msra.mxu2 %v184_v35  ;;  %v238_v46 = vld [vmem:[%s442_s2] ss:$0 sm:$0xff]  ;;  %v172_v51 = vld [vmem:[#allocation8 + $0x8] sm:$0xff]  ;;  %v171_v52 = vld [vmem:[#allocation8] sm:$0xff] }
  0x24   :  { %117 = vmatpush.msra.mxu0 %v96_v14  ;;  %v239_v53 = vld [vmem:[%s444_s4] ss:$0 sm:$0xff] }
  0x25   :  { %158 = vmatpush.msra.mxu1 %v137_v19  ;;  %194 = vmatpush.msra.mxu2 %v183_v36  ;;  %v240_v57 = vld [vmem:[%s446_s6] ss:$0 sm:$0xff] }
  0x26   :  { %118 = vmatpush.msra.mxu0 %v95_v16 }
  0x27   :  { %159 = vmatpush.msra.mxu1 %v136_v21  ;;  %195 = vmatpush.msra.mxu2 %v182_v37 }
  0x28   :  { %119 = vmatpush.msra.mxu0 %v94_v18 }
  0x29   :  { %160 = vmatpush.msra.mxu1 %v135_v23  ;;  %196 = vmatpush.msra.mxu2 %v181_v38 }
  0x2a   :  { %120 = vmatpush.msra.mxu0 %v93_v20 }
  0x2b   :  { %161 = vmatpush.msra.mxu1 %v134_v25  ;;  %197 = vmatpush.msra.mxu2 %v180_v39 }
  0x2c   :  { %121 = vmatpush.msra.mxu0 %v92_v22 }
  0x2d   :  { %162 = vmatpush.msra.mxu1 %v133_v27  ;;  %198 = vmatpush.msra.mxu2 %v179_v40 }
  0x2e   :  { %122 = vmatpush.msra.mxu0 %v91_v24 }
  0x2f   :  { %163 = vmatpush.msra.mxu1 %v132_v30  ;;  %199 = vmatpush.msra.mxu2 %v178_v41 }
  0x30   :  { %123 = vmatpush.msra.mxu0 %v90_v26 }
  0x31   :  { %164 = vmatpush.msra.mxu1 %v131_v31  ;;  %200 = vmatpush.msra.mxu2 %v177_v42 }
  0x32   :  { %124 = vmatpush.msra.mxu0 %v89_v28 }
  0x33   :  { %125 = vmatmul.f32.vlgmr.msra.gmra.mxu0 %v88_v29  ;;  %165 = vmatpush.msra.mxu1 %v130_v32 }
  0x34   :  { %201 = vmatpush.msra.mxu2 %v176_v43 }
  0x36   :  { %202 = vmatpush.msra.mxu2 %v175_v44 }
  0x38   :  { %203 = vmatpush.msra.mxu2 %v174_v45 }
  0x3a   :  { %204 = vmatpush.msra.mxu2 %v173_v50 }
  0x3c   :  { %205 = vmatpush.msra.mxu2 %v172_v51 }
  0x3e   :  { %206 = vmatpush.msra.mxu2 %v171_v52 }
  0xb0   :  { %v126_v47 = vpop.f32.mrf.mxu0 }
  0xb1   :  { %v127_v48 = vadd.f32 %v238_v46, %v126_v47 }
  0xb3   :  { %v129_v49 = vmax.f32 %v127_v48, 0.0 }
  0xb5   :  { %166 = vmatmul.f32.vlgmr.msra.gmra.mxu1 %v129_v49 }
 0x132   :  { %v167_v54 = vpop.f32.mrf.mxu1 }
 0x133   :  { %v168_v55 = vadd.f32 %v239_v53, %v167_v54 }
 0x135   :  { %v170_v56 = vmax.f32 %v168_v55, 0.0 }
 0x137   :  { %207 = vmatmul.f32.vlgmr.msra.gmra.mxu2 %v170_v56 }
 0x1ba   :  { %v208_v58 = vpop.f32.mrf.mxu2 }
 0x1bb   :  { %v209_v59 = vadd.f32 %v240_v57, %v208_v58 }
 0x1bd   :  { %211 = vst [vmem:[#allocation10] sm:$0xff] %v209_v59 }
 0x1be   :  { %222 = dma.vmem_to_hbm [thread:$0]  %s218_s25, 128, %s220_s28, [#allocation4]  }
 0x1bf   :  { %367 = dma.done.wait [#allocation4], 128  }
 0x1c0   :  { %368 = vsyncadd [#allocation4], 4294967168 }
 0x1c1   :  { %227 = vsyncpa [#allocation3], 1 }
 0x1c2   :  { %228 = vsyncpa [#allocation6], 1 }
 0x1c3   :  { %229 = vsyncpa [#allocation9], 1 }
 0x1c4   :  { %230 = vsyncpa [#allocation4], 1 }

</bundles_post_ra>
